<compile_context>
chip_gen: v5e
topology: v5e:2x2
jax: 0.10.0
libtpu: 0.0.40
codegen_flags: <defaults>
</compile_context>

<pallas_src>
import jax
import jax.numpy as jnp
import numpy as np
from jax.experimental import pallas as pl
from jax.experimental.pallas import tpu as pltpu


def _normalize_kernel(x_ref, scale_ref, shift_ref, o_ref):
    # x_ref:     (block_r, block_l) tile of the flattened image data
    # scale_ref: (block_r, 1) per-row 1/std   (broadcast over lanes)
    # shift_ref: (block_r, 1) per-row -mean/std
    x = x_ref[...].astype(jnp.float32)
    o_ref[...] = (x * scale_ref[...] + shift_ref[...]).astype(o_ref.dtype)


def _choose_blocks(R, L, itemsize, target_bytes=2 * 1024 * 1024):
    """Pick a lane-dense block that is ~target_bytes and respects (8, 128) rules."""
    # Lane (last) dim: a large multiple of 128, or the full dim if unaligned.
    if L % 128 == 0 and L > 4096:
        block_l = 4096
    else:
        block_l = L  # full-dim blocks are always legal
    # Row (second-to-last) dim: multiple of 8 (or the full dim), sized to target.
    rows = max(1, target_bytes // (block_l * itemsize))
    if rows >= R:
        block_r = R
    else:
        block_r = max(8, (rows // 8) * 8)
    return block_r, block_l


def normalize(x, mean, std):
    """(x - mean[None,:,None,None]) / std[None,:,None,None] for NCHW x."""
    N, C, H, W = x.shape
    R = N * C
    L = H * W

    mean = jnp.asarray(mean, dtype=jnp.float32)
    std = jnp.asarray(std, dtype=jnp.float32)

    # Precompute per-channel FMA coefficients, expanded per flattened row
    # (row r of the (N*C, H*W) view corresponds to channel r % C).
    scale_c = 1.0 / std                    # (C,)
    shift_c = -mean / std                  # (C,)
    scale = jnp.tile(scale_c, N).reshape(R, 1)   # (R, 1)
    shift = jnp.tile(shift_c, N).reshape(R, 1)   # (R, 1)

    x2d = x.reshape(R, L)                  # free view for contiguous NCHW

    itemsize = jnp.dtype(x.dtype).itemsize
    block_r, block_l = _choose_blocks(R, L, itemsize)

    grid = (pl.cdiv(R, block_r), pl.cdiv(L, block_l))

    grid_spec = pltpu.PrefetchScalarGridSpec(
        num_scalar_prefetch=0,
        grid=grid,
        in_specs=[
            pl.BlockSpec((block_r, block_l), lambda i, j: (i, j)),  # x
            pl.BlockSpec((block_r, 1), lambda i, j: (i, 0)),        # scale
            pl.BlockSpec((block_r, 1), lambda i, j: (i, 0)),        # shift
        ],
        out_specs=pl.BlockSpec((block_r, block_l), lambda i, j: (i, j)),
    )

    out2d = pl.pallas_call(
        _normalize_kernel,
        out_shape=jax.ShapeDtypeStruct((R, L), x.dtype),
        grid_spec=grid_spec,
        compiler_params=pltpu.CompilerParams(
            dimension_semantics=("parallel", "parallel"),
        ),
    )(x2d, scale, shift)

    return out2d.reshape(N, C, H, W)


if __name__ == "__main__":
    key = jax.random.PRNGKey(0)
    # Module hardcodes 3 channels (reshape(1, 3, 1, 1)).
    N, C, H, W = 2, 3, 16, 16
    x = jax.random.normal(key, (N, C, H, W), dtype=jnp.float32)

    # Deterministic per-channel stats (ImageNet-style buffers from __init__)
    mean = np.array([0.485, 0.456, 0.406], dtype=np.float32)
    std = np.array([0.229, 0.224, 0.225], dtype=np.float32)

    out = normalize(x, mean, std)
    out = jax.block_until_ready(out)

    # Reference check (plain JAX)
    ref = (x - jnp.asarray(mean).reshape(1, 3, 1, 1)) / jnp.asarray(std).reshape(1, 3, 1, 1)
    np.testing.assert_allclose(np.asarray(out), np.asarray(ref), rtol=1e-5, atol=1e-5)

    print("KERNEL_OK")
</pallas_src>

<mosaic_0001>
module attributes {stable_mosaic.version = 11 : i64} {
  func.func @_normalize_kernel(%arg0: i32, %arg1: i32, %arg2: memref<6x256xf32, #tpu.memory_space<vmem>>, %arg3: memref<6x1xf32, #tpu.memory_space<vmem>>, %arg4: memref<6x1xf32, #tpu.memory_space<vmem>>, %arg5: memref<6x256xf32, #tpu.memory_space<vmem>>) attributes {dimension_semantics = [#tpu.dimension_semantics<parallel>, #tpu.dimension_semantics<parallel>], iteration_bounds = array<i64: 1, 1>, scalar_prefetch = 0 : i64, scratch_operands = 0 : i64, tpu.core_type = #tpu.core_type<tc>, window_params = [{transform_indices = @transform_0, window_bounds = array<i64: 6, 256>}, {transform_indices = @transform_1, window_bounds = array<i64: 6, 1>}, {transform_indices = @transform_2, window_bounds = array<i64: 6, 1>}, {transform_indices = @transform_3, window_bounds = array<i64: 6, 256>}]} {
    %c0 = arith.constant 0 : index
    %c0_0 = arith.constant 0 : index
    %0 = vector.load %arg2[%c0, %c0_0] : memref<6x256xf32, #tpu.memory_space<vmem>>, vector<6x256xf32>
    %c0_1 = arith.constant 0 : index
    %c0_2 = arith.constant 0 : index
    %1 = vector.load %arg3[%c0_1, %c0_2] : memref<6x1xf32, #tpu.memory_space<vmem>>, vector<6x1xf32>
    %2 = vector.broadcast %1 : vector<6x1xf32> to vector<6x256xf32>
    %3 = arith.mulf %0, %2 : vector<6x256xf32>
    %c0_3 = arith.constant 0 : index
    %c0_4 = arith.constant 0 : index
    %4 = vector.load %arg4[%c0_3, %c0_4] : memref<6x1xf32, #tpu.memory_space<vmem>>, vector<6x1xf32>
    %5 = vector.broadcast %4 : vector<6x1xf32> to vector<6x256xf32>
    %6 = arith.addf %3, %5 : vector<6x256xf32>
    %c0_5 = arith.constant 0 : index
    %c0_6 = arith.constant 0 : index
    %7 = vector.load %arg5[%c0_5, %c0_6] : memref<6x256xf32, #tpu.memory_space<vmem>>, vector<6x256xf32>
    tpu.vector_store %arg5[%c0_5, %c0_6], %6 {strides = array<i32>} : memref<6x256xf32, #tpu.memory_space<vmem>>, vector<6x256xf32>,
    return
  }
  func.func @transform_0(%arg0: i32, %arg1: i32) -> (i32, i32) {
    %c0_i32 = arith.constant 0 : i32
    return %arg0, %arg1 : i32, i32
  }
  func.func @transform_1(%arg0: i32, %arg1: i32) -> (i32, i32) {
    %c0_i32 = arith.constant 0 : i32
    %c0_i32_0 = arith.constant 0 : i32
    return %arg0, %c0_i32 : i32, i32
  }
  func.func @transform_2(%arg0: i32, %arg1: i32) -> (i32, i32) {
    %c0_i32 = arith.constant 0 : i32
    %c0_i32_0 = arith.constant 0 : i32
    return %arg0, %c0_i32 : i32, i32
  }
  func.func @transform_3(%arg0: i32, %arg1: i32) -> (i32, i32) {
    %c0_i32 = arith.constant 0 : i32
    return %arg0, %arg1 : i32, i32
  }
}

</mosaic_0001>

<bundles_post_ra>
// kernel: tpu_custom_call.1
= control target key start
LH: loop header
LB: loop body
LE: loop exit
PB: predicated region body
PF: predicated region fallthrough
CT: control target
= control target key end

     0   :  { %v80_v1 = vmov 0   ;;  %s117_s0 = inlined_call_operand.vmem [shape: f32[6,256], index: 0, kind: input, shape index: {}]   ;;  %s118_s1 = inlined_call_operand.vmem [shape: f32[6,1], index: 1, kind: input, shape index: {}]   ;;  %s119_s2 = inlined_call_operand.vmem [shape: f32[6,1], index: 2, kind: input, shape index: {}]   ;;  %s120_s3 = inlined_call_operand.hbm [shape: f32[6,256], index: 3, kind: output, shape index: {}]  }
   0x1   :  { %v17_v0 = vld [vmem:[%s118_s1] sm:$0x3f]  ;;  %53 = vset.pattern.permute.xlu0 %v80_v1 }
   0x2   :  { %8 = vsyncpa [#allocation3], 0  ;;  %20 = vperm.xlu0 %53, %v17_v0   ;;  %v25_v2 = vld [vmem:[%s119_s2] sm:$0x3f]  ;;  %v16_v5 = vld [vmem:[%s117_s0 + $0x8] sm:$0x3f] }
   0x3   :  { %v15_v4 = vld [vmem:[%s117_s0] sm:$0x3f]  ;;  %s81_s1 = smov [#allocation2]   ;;  %s42_s23 = sshll.u32 %s120_s3, 4  ;;  %s43_s23 = int_to_ptr.hbm [resolvable:$true] %s42_s23 }
   0x4   :  { %s40_s20 = sshll.u32 %s81_s1, 4  ;;  %s41_s20 = int_to_ptr.vmem [resolvable:$true] %s40_s20 }
   0xa   :  { %28 = vperm.xlu0 %53, %v25_v2  }
  0x74   :  { %v21_v3 = vpop.permute.xlu0 %20 }
  0x75   :  { %v23_v6 = vmul.f32 %v21_v3, %v15_v4  ;;  %v24_v7 = vmul.f32 %v21_v3, %v16_v5 }
  0x7c   :  { %v29_v8 = vpop.permute.xlu0 %28 }
  0x7d   :  { %v31_v9 = vadd.f32 %v29_v8, %v23_v6  ;;  %v32_v10 = vadd.f32 %v29_v8, %v24_v7 }
  0x7f   :  { %33 = vst [vmem:[#allocation2] sm:$0x3f] %v31_v9 }
  0x80   :  { %34 = vst [vmem:[#allocation2 + $0x8] sm:$0x3f] %v32_v10 }
  0x81   :  { %45 = dma.vmem_to_hbm [thread:$0]  %s41_s20, 256, %s43_s23, [#allocation3]  }
  0x82   :  { %78 = dma.done.wait [#allocation3], 256  }
  0x83   :  { %79 = vsyncadd [#allocation3], 4294967040 }
  0x84   :  { %50 = vsyncpa [#allocation3], 1 }

</bundles_post_ra>
